<compile_context>
chip_gen: v7x
topology: tpu7x:2x2x1
jax: 0.10.0
libtpu: 0.0.40
codegen_flags: <defaults>
</compile_context>

<pallas_src>
import jax
import jax.numpy as jnp
from jax.experimental import pallas as pl
from jax.experimental.pallas import tpu as pltpu


# ---------------------------------------------------------------------------
# Kernel 1: pure alias.  Output 0 is aliased to input 0, so the data is
# already in place; the body does nothing (0 bytes of HBM traffic inside the
# kernel).  Use this path when the caller can donate the input.
# ---------------------------------------------------------------------------
def _alias_identity_kernel(x_hbm, o_hbm):
    del x_hbm, o_hbm  # identity via input/output aliasing; nothing to do


# ---------------------------------------------------------------------------
# Kernel 2: materialized copy as a direct HBM->HBM DMA (no VMEM staging).
# `chunks` is a static tuple of (start, size) along the leading axis; all
# descriptors are started before any wait so several are in flight at once.
# ---------------------------------------------------------------------------
def _make_dma_copy_kernel(chunks):
    single_full = len(chunks) == 1

    def kernel(x_hbm, o_hbm, sems):
        descs = []
        if single_full:
            descs.append(pltpu.make_async_copy(x_hbm, o_hbm, sems.at[0]))
        else:
            for c, (start, size) in enumerate(chunks):
                descs.append(
                    pltpu.make_async_copy(
                        x_hbm.at[pl.ds(start, size)],
                        o_hbm.at[pl.ds(start, size)],
                        sems.at[c],
                    )
                )
        for d in descs:
            d.start()
        for d in descs:
            d.wait()

    return kernel


def efficientnet_forward(x, *, alias_input=False):
    """EfficientNet.forward(x) == x.

    alias_input=False (default): HBM->HBM DMA copy (pl.ANY refs, chunked DMA
        descriptors for large tensors).
    alias_input=True: input_output_aliases={0: 0} with a no-op kernel — the
        identity with zero kernel-side HBM traffic (best when x is donated).
    """
    orig_shape = x.shape
    x_view = x.reshape(1) if x.ndim == 0 else x

    if alias_input:
        out = pl.pallas_call(
            _alias_identity_kernel,
            out_shape=jax.ShapeDtypeStruct(x_view.shape, x_view.dtype),
            in_specs=[pl.BlockSpec(memory_space=pl.ANY)],
            out_specs=pl.BlockSpec(memory_space=pl.ANY),
            input_output_aliases={0: 0},
        )(x_view)
        return out.reshape(orig_shape)

    total_bytes = int(x_view.size) * int(jnp.dtype(x_view.dtype).itemsize)
    lead = int(x_view.shape[0])

    # Chunk big copies into up to 4 leading-axis pieces so multiple DMA
    # descriptors are in flight; small tensors get one whole-array descriptor.
    CHUNK_THRESHOLD_BYTES = 4 * 1024 * 1024
    nchunks = min(4, lead) if (total_bytes >= CHUNK_THRESHOLD_BYTES and lead >= 2) else 1

    base, rem = divmod(lead, nchunks)
    chunks, start = [], 0
    for c in range(nchunks):
        size = base + (1 if c < rem else 0)
        chunks.append((start, size))
        start += size
    chunks = tuple(chunks)

    out = pl.pallas_call(
        _make_dma_copy_kernel(chunks),
        out_shape=jax.ShapeDtypeStruct(x_view.shape, x_view.dtype),
        in_specs=[pl.BlockSpec(memory_space=pl.ANY)],
        out_specs=pl.BlockSpec(memory_space=pl.ANY),
        scratch_shapes=[pltpu.SemaphoreType.DMA((nchunks,))],
        cost_estimate=pl.CostEstimate(
            flops=0, transcendentals=0, bytes_accessed=2 * total_bytes
        ),
    )(x_view)
    return out.reshape(orig_shape)


if __name__ == "__main__":
    key = jax.random.PRNGKey(0)

    # Small NCHW input; forward is the identity regardless of channel count.
    x = jax.random.normal(key, (2, 4, 16, 16), jnp.float32)

    # Default path: HBM->HBM DMA copy.
    out = jax.block_until_ready(efficientnet_forward(x))
    assert out.shape == x.shape and out.dtype == x.dtype
    assert bool(jnp.all(out == x))

    # Aliased path: output aliases the input buffer (zero-copy when donated).
    out_alias = jax.block_until_ready(efficientnet_forward(x, alias_input=True))
    assert out_alias.shape == x.shape and out_alias.dtype == x.dtype
    assert bool(jnp.all(out_alias == x))

    print("KERNEL_OK")
</pallas_src>

<mosaic_0001>
module attributes {stable_mosaic.version = 11 : i64} {
  func.func @kernel(%arg0: memref<2x4x16x16xf32, #tpu.memory_space<any>>, %arg1: memref<2x4x16x16xf32, #tpu.memory_space<any>>, %arg2: memref<1x!tpu.dma_semaphore, #tpu.memory_space<semaphore_mem>>) attributes {dimension_semantics = [], scalar_prefetch = 0 : i64, scratch_operands = 1 : i64, tpu.core_type = #tpu.core_type<tc>} {
    %c0_i32 = arith.constant 0 : i32
    %0 = tpu.memref_slice %arg2[%c0_i32] : memref<1x!tpu.dma_semaphore, #tpu.memory_space<semaphore_mem>> -> memref<1x!tpu.dma_semaphore, #tpu.memory_space<semaphore_mem>>
    %1 = tpu.memref_squeeze %0 : memref<1x!tpu.dma_semaphore, #tpu.memory_space<semaphore_mem>> -> memref<!tpu.dma_semaphore, #tpu.memory_space<semaphore_mem>>
    tpu.enqueue_dma source(%arg0 : memref<2x4x16x16xf32, #tpu.memory_space<any>>) target(%arg1 : memref<2x4x16x16xf32, #tpu.memory_space<any>>) target_semaphore(%1 : memref<!tpu.dma_semaphore, #tpu.memory_space<semaphore_mem>>)
    %c0_i32_0 = arith.constant 0 : i32
    %2 = tpu.memref_slice %arg2[%c0_i32_0] : memref<1x!tpu.dma_semaphore, #tpu.memory_space<semaphore_mem>> -> memref<1x!tpu.dma_semaphore, #tpu.memory_space<semaphore_mem>>
    %3 = tpu.memref_squeeze %2 : memref<1x!tpu.dma_semaphore, #tpu.memory_space<semaphore_mem>> -> memref<!tpu.dma_semaphore, #tpu.memory_space<semaphore_mem>>
    tpu.wait_dma2 semaphore(%3 : memref<!tpu.dma_semaphore, #tpu.memory_space<semaphore_mem>>) src(%arg0 : memref<2x4x16x16xf32, #tpu.memory_space<any>>) dst(%arg1 : memref<2x4x16x16xf32, #tpu.memory_space<any>>)
    return
  }
}

</mosaic_0001>

<bundles_post_ra>
// kernel: tpu_custom_call.1
= control target key start
LH: loop header
LB: loop body
LE: loop exit
PB: predicated region body
PF: predicated region fallthrough
CT: control target
= control target key end

     0   :  { %s36_s6 = smov [#allocation2]   ;;  %s37_s7 = smov [#allocation3]   ;;  %s55_s0 = inlined_call_operand.hbm [shape: f32[2,4,16,16], index: 0, kind: input, shape index: {}]   ;;  %s56_s1 = inlined_call_operand.hbm [shape: f32[2,4,16,16], index: 1, kind: output, shape index: {}]  }
   0x1   :  { %s38_s8 = smov 0  }
   0x2   :  { %18 = dma.general %s55_s0, 2048, %s56_s1, %s36_s6, %s37_s7, [#allocation4], %s38_s8, 0  }
   0x3   :  { %34 = dma.done.wait [#allocation2], 2048 }
   0x4   :  { %35 = vsyncadd [#allocation2], 4294965248 }
   0x5   :  { %24 = vsyncmov [#allocation2] }
   0x8   :  { %s25_s13 = vpop.sfrf %24 }
   0x9   :  { %p30_p0 = scmp.ne.s32.totalorder %s25_s13, 0 }
   0xb   :  { %29 = shalt.err (%p30_p0)  }

</bundles_post_ra>
